<compile_context>
chip_gen: v7x
topology: tpu7x:2x2x1
jax: 0.10.0
libtpu: 0.0.40
codegen_flags: <defaults>
</compile_context>

<pallas_src>
import jax
import jax.numpy as jnp
from jax import lax
from jax.experimental import pallas as pl
from jax.experimental.pallas import tpu as pltpu


def _round_up(x, m):
    return (x + m - 1) // m * m


def skipgram_kernel(tok_ref, emb_ref, w_ref, b_ref, out_ref, x_scratch):
    """Grid = (row_tiles, vocab_tiles).

    tok_ref   : (B_pad,) int32 in SMEM (scalar prefetch)
    emb_ref   : (V, E)   embedding table, VMEM-resident (same block every step)
    w_ref     : (E, TN)  fc-weight tile (transposed fc.weight)
    b_ref     : (1, TN)  fc-bias tile
    out_ref   : (TM, TN) output logits tile
    x_scratch : (TM, E)  f32 scratch holding relu(embedding(text_tile))
    """
    i = pl.program_id(0)          # row (token-batch) tile
    j = pl.program_id(1)          # vocab tile
    tm = x_scratch.shape[0]

    # Gather + ReLU once per row tile; reuse the scratch for every vocab tile.
    @pl.when(j == 0)
    def _():
        def body(r, carry):
            tok = tok_ref[i * tm + r]                      # dynamic scalar (SMEM)
            row = emb_ref[pl.ds(tok, 1), :]                # (1, E) gather
            x_scratch[pl.ds(r, 1), :] = jnp.maximum(row, 0.0).astype(jnp.float32)
            return carry
        lax.fori_loop(0, tm, body, 0)

    # (TM, E) @ (E, TN) on the MXU, f32 accumulation, lane-dense (TM, TN) store.
    logits = jnp.dot(x_scratch[...], w_ref[...],
                     preferred_element_type=jnp.float32)
    out_ref[...] = (logits + b_ref[...].astype(jnp.float32)).astype(out_ref.dtype)


def skipgram_forward(text, emb, w_t, b, *, tm=128, tn=256):
    """text: (B,) int, emb: (V, E), w_t: (E, V) (fc.weight transposed), b: (V,)."""
    B = text.shape[0]
    V, E = emb.shape
    assert w_t.shape == (E, V)
    assert b.shape == (V,)

    # Pad batch and vocab to tile multiples (sliced off at the end).
    tm = min(tm, _round_up(B, 8))
    tn = min(tn, _round_up(V, 128))
    Bp = _round_up(B, tm)
    Vp = _round_up(V, tn)

    text_p = jnp.pad(text.astype(jnp.int32), (0, Bp - B))          # pad with id 0
    w_p = jnp.pad(w_t, ((0, 0), (0, Vp - V)))
    b_p = jnp.pad(b, (0, Vp - V)).reshape(1, Vp)

    grid_spec = pltpu.PrefetchScalarGridSpec(
        num_scalar_prefetch=1,                    # token ids -> SMEM
        grid=(Bp // tm, Vp // tn),
        in_specs=[
            pl.BlockSpec((V, E), lambda i, j, tok: (0, 0)),     # emb (resident)
            pl.BlockSpec((E, tn), lambda i, j, tok: (0, j)),    # fc weight tile
            pl.BlockSpec((1, tn), lambda i, j, tok: (0, j)),    # fc bias tile
        ],
        out_specs=pl.BlockSpec((tm, tn), lambda i, j, tok: (i, j)),
        scratch_shapes=[pltpu.VMEM((tm, E), jnp.float32)],
    )

    out = pl.pallas_call(
        skipgram_kernel,
        out_shape=jax.ShapeDtypeStruct((Bp, Vp), jnp.float32),
        grid_spec=grid_spec,
        compiler_params=pltpu.CompilerParams(
            dimension_semantics=("parallel", "arbitrary")),
    )(text_p, emb, w_p, b_p)

    return out[:B, :V]


def skipgram_reference(text, emb, w_t, b):
    """Plain-JAX reference mirroring the PyTorch forward."""
    x = jnp.maximum(emb[text], 0.0)        # relu(embedding(text))
    return x @ w_t + b                     # fc(...)


if __name__ == "__main__":
    # Small deterministic setup (lane-friendly sizes).
    vocab_size = 512
    embed_dim = 128
    batch = 256

    key = jax.random.PRNGKey(0)
    k_emb, k_w, k_b, k_txt = jax.random.split(key, 4)

    emb = jax.random.normal(k_emb, (vocab_size, embed_dim), jnp.float32) * 0.1
    # fc.weight is (V, E) in torch; stored transposed as (E, V) here.
    w_t = jax.random.normal(k_w, (embed_dim, vocab_size), jnp.float32) * 0.1
    b = jax.random.normal(k_b, (vocab_size,), jnp.float32) * 0.1
    text = jax.random.randint(k_txt, (batch,), 0, vocab_size, dtype=jnp.int32)

    out = skipgram_forward(text, emb, w_t, b)
    out = jax.block_until_ready(out)

    ref = skipgram_reference(text, emb, w_t, b)
    assert out.shape == (batch, vocab_size)
    assert jnp.allclose(out, ref, atol=1e-4, rtol=1e-4), "mismatch vs reference"

    print("KERNEL_OK")
</pallas_src>

<mosaic_0001>
module attributes {stable_mosaic.version = 11 : i64} {
  func.func @skipgram_kernel(%arg0: i32, %arg1: i32, %arg2: memref<256xi32, #tpu.memory_space<smem>>, %arg3: memref<512x128xf32, #tpu.memory_space<vmem>>, %arg4: memref<128x256xf32, #tpu.memory_space<vmem>>, %arg5: memref<1x256xf32, #tpu.memory_space<vmem>>, %arg6: memref<128x256xf32, #tpu.memory_space<vmem>>, %arg7: memref<128x128xf32, #tpu.memory_space<vmem>>) attributes {dimension_semantics = [#tpu.dimension_semantics<parallel>, #tpu.dimension_semantics<arbitrary>], iteration_bounds = array<i64: 2, 2>, scalar_prefetch = 1 : i64, scratch_operands = 1 : i64, tpu.core_type = #tpu.core_type<tc>, window_params = [{pipeline_mode = #tpu.pipeline_mode<synchronous>, transform_indices = @transform_0, window_bounds = array<i64: 512, 128>}, {transform_indices = @transform_1, window_bounds = array<i64: 128, 256>}, {transform_indices = @transform_2, window_bounds = array<i64: 1, 256>}, {transform_indices = @transform_3, window_bounds = array<i64: 128, 256>}]} {
    %c0_i32 = arith.constant 0 : i32
    %0 = arith.cmpi eq, %arg1, %c0_i32 : i32
    %1 = arith.extui %0 : i1 to i32
    %c0_i32_0 = arith.constant 0 : i32
    %2 = arith.cmpi ne, %1, %c0_i32_0 : i32
    scf.if %2 {
      %c0_i32_8 = arith.constant 0 : i32
      %c128_i32 = arith.constant 128 : i32
      %10 = arith.addi %c0_i32_8, %c128_i32 : i32
      %c1_i32 = arith.constant 1 : i32
      scf.for %arg8 = %c0_i32_8 to %10 step %c1_i32  : i32 {
        %c128_i32_10 = arith.constant 128 : i32
        %11 = arith.muli %arg0, %c128_i32_10 : i32
        %12 = arith.addi %11, %arg8 : i32
        %13 = arith.index_cast %12 : i32 to index
        %14 = memref.load %arg2[%13] : memref<256xi32, #tpu.memory_space<smem>>
        %15 = arith.index_cast %14 : i32 to index
        %c0_11 = arith.constant 0 : index
        %16 = vector.load %arg3[%15, %c0_11] : memref<512x128xf32, #tpu.memory_space<vmem>>, vector<1x128xf32>
        %cst_12 = arith.constant 0.000000e+00 : f32
        %17 = vector.broadcast %cst_12 : f32 to vector<1x128xf32>
        %18 = arith.maximumf %16, %17 : vector<1x128xf32>
        %19 = arith.index_cast %arg8 : i32 to index
        %c0_13 = arith.constant 0 : index
        %20 = vector.load %arg7[%19, %c0_13] : memref<128x128xf32, #tpu.memory_space<vmem>>, vector<1x128xf32>
        tpu.vector_store %arg7[%19, %c0_13], %18 {strides = array<i32>} : memref<128x128xf32, #tpu.memory_space<vmem>>, vector<1x128xf32>,
      }
      %c128_i32_9 = arith.constant 128 : i32
    } else {
    }
    %c0 = arith.constant 0 : index
    %c0_1 = arith.constant 0 : index
    %3 = vector.load %arg7[%c0, %c0_1] : memref<128x128xf32, #tpu.memory_space<vmem>>, vector<128x128xf32>
    %c0_2 = arith.constant 0 : index
    %c0_3 = arith.constant 0 : index
    %4 = vector.load %arg4[%c0_2, %c0_3] : memref<128x256xf32, #tpu.memory_space<vmem>>, vector<128x256xf32>
    %cst = arith.constant dense<0.000000e+00> : vector<128x256xf32>
    %5 = tpu.matmul %3, %4, %cst {dimension_numbers = #tpu.dot_dimension_numbers<[1], [0], [0], [1], [0, 0, 1, 1], [], []>} : vector<128x128xf32>, vector<128x256xf32>, vector<128x256xf32> -> vector<128x256xf32>
    %c0_4 = arith.constant 0 : index
    %c0_5 = arith.constant 0 : index
    %6 = vector.load %arg5[%c0_4, %c0_5] : memref<1x256xf32, #tpu.memory_space<vmem>>, vector<1x256xf32>
    %7 = vector.broadcast %6 : vector<1x256xf32> to vector<128x256xf32>
    %8 = arith.addf %5, %7 : vector<128x256xf32>
    %c0_6 = arith.constant 0 : index
    %c0_7 = arith.constant 0 : index
    %9 = vector.load %arg6[%c0_6, %c0_7] : memref<128x256xf32, #tpu.memory_space<vmem>>, vector<128x256xf32>
    tpu.vector_store %arg6[%c0_6, %c0_7], %8 {strides = array<i32>} : memref<128x256xf32, #tpu.memory_space<vmem>>, vector<128x256xf32>,
    return
  }
  func.func @transform_0(%arg0: i32, %arg1: i32, %arg2: memref<256xi32, #tpu.memory_space<smem>>) -> (i32, i32) {
    %c0_i32 = arith.constant 0 : i32
    %c0_i32_0 = arith.constant 0 : i32
    %c0_i32_1 = arith.constant 0 : i32
    return %c0_i32, %c0_i32_0 : i32, i32
  }
  func.func @transform_1(%arg0: i32, %arg1: i32, %arg2: memref<256xi32, #tpu.memory_space<smem>>) -> (i32, i32) {
    %c0_i32 = arith.constant 0 : i32
    %c0_i32_0 = arith.constant 0 : i32
    return %c0_i32, %arg1 : i32, i32
  }
  func.func @transform_2(%arg0: i32, %arg1: i32, %arg2: memref<256xi32, #tpu.memory_space<smem>>) -> (i32, i32) {
    %c0_i32 = arith.constant 0 : i32
    %c0_i32_0 = arith.constant 0 : i32
    return %c0_i32, %arg1 : i32, i32
  }
  func.func @transform_3(%arg0: i32, %arg1: i32, %arg2: memref<256xi32, #tpu.memory_space<smem>>) -> (i32, i32) {
    %c0_i32 = arith.constant 0 : i32
    return %arg0, %arg1 : i32, i32
  }
}

</mosaic_0001>

<bundles_post_ra>
// kernel: tpu_custom_call.1
= control target key start
LH: loop header
LB: loop body
LE: loop exit
PB: predicated region body
PF: predicated region fallthrough
CT: control target
= control target key end

     0   :  { %s1514_s0 = inlined_call_operand.hbm [shape: s32[256], index: 0, kind: input, shape index: {}]   ;;  %s1515_s1 = inlined_call_operand.hbm [shape: f32[512,128], index: 1, kind: input, shape index: {}]   ;;  %s1516_s2 = inlined_call_operand.hbm [shape: f32[128,512], index: 2, kind: input, shape index: {}]   ;;  %s1517_s3 = inlined_call_operand.vmem [shape: f32[1,512], index: 3, kind: input, shape index: {}]   ;;  %s1518_s4 = inlined_call_operand.hbm [shape: f32[256,512], index: 4, kind: output, shape index: {}]  }
   0x1   :  { %1529 = sst [smem:[#allocation19_spill]] %s1515_s1  ;;  %s851_s17 = scalar_lea.hbm %s1514_s0, 32 }
   0x2   :  { %p852_p0 = scmp.ne.s32.totalorder %s1514_s0, %s851_s17  ;;  %p855_p1 = scmp.lt.u32.totalorder %s851_s17, %s1514_s0 }
   0x4   :  { %p857_p2 = pnand %p855_p1, %p852_p0 }
   0x6   :  { %860 = shalt.err (!%p857_p2)  }
   0x7   :  { %s1057_s22 = smov [#allocation4]  }
   0x8   :  { %10 = dma.hbm_to_smem %s1514_s0, 32, %s1057_s22, [#allocation3] }
   0x9   :  { %995 = dma.done.wait [#allocation3], 32 }
   0xa   :  { %996 = vsyncadd [#allocation3], 4294967264 }
   0xb   :  { %12 = sfence }
   0xc   :  { %13 = vsyncpa [#allocation6], 0 }
   0xd   :  { %14 = vsyncpa [#allocation9], 0 }
   0xe   :  { %16 = vsyncpa [#allocation9 + $0x1], 0 }
   0xf   :  { %17 = vsyncpa [#allocation7], 0 }
  0x10   :  { %19 = vsyncpa [#allocation7 + $0x1], 0  ;;  %s1107_s25 = smov 0   ;;  %s1109_s26 = smov 0  }
  0x11   :  { %s1111_s27 = smov 0   ;;  %s1113_s28 = smov 0  }
  0x12   :  { %s1115_s29 = smov 0   ;;  %s1117_s30 = smov 0  }
  0x13   :  { %s1119_s0 = smov 0   ;;  %s1121_s5 = smov 0  }
  0x14   :  { %s1123_s6 = smov 0   ;;  %s1125_s7 = smov 0  }
  0x15   :  { %s1127_s8 = smov 0  }
  0x16 LB: > { %1530 = sst [smem:[#allocation15_spill]] %s1011_s25  ;;  %s648_s9 = sadd.s32 4294967295, %s1051_s8   ;;  %s1051_s8 = sphi %s1127_s8, %s25_s8   ;;  %s1047_s7 = sphi %s1125_s7, %s1562_s7   ;;  %s1043_s6 = sphi %s1123_s6, %s1554_s6   ;;  %s1039_s5 = sphi %s1121_s5, %s1561_s5   ;;  %s1035_s0 = sphi %s1119_s0, %s1553_s0   ;;  %s1031_s30 = sphi %s1117_s30, %s1560_s30   ;;  %s1027_s29 = sphi %s1115_s29, %s1559_s29   ;;  %s1023_s28 = sphi %s1113_s28, %s1558_s28   ;;  %s1019_s27 = sphi %s1111_s27, %s1557_s27   ;;  %s1015_s26 = sphi %s1109_s26, %s1556_s26   ;;  %s1011_s25 = sphi %s1107_s25, %s1555_s25  }
  0x17   : > { %1531 = sst [smem:[#allocation16_spill]] %s1043_s6  ;;  %s649_s10 = sadd.s32 4294967294, %s1051_s8  }
  0x18   : > { %p72_p3 = scmp.ne.s32.totalorder %s1031_s30, %s1027_s29  ;;  %p73_p4 = scmp.eq.s32.totalorder %s1051_s8, 0 }
  0x19   : > { %p78_p5 = scmp.ne.s32.totalorder %s1027_s29, %s1023_s28  ;;  %p1167_p6 = scmp.eq.s32.totalorder %s648_s9, 0 }
  0x1a   : > { %p1172_p7 = por %p73_p4, %p72_p3  ;;  %p129_p8 = scmp.ne.s32.totalorder %s1019_s27, %s1015_s26 }
  0x1b   : > { %s1532_s12 = scalar_select %p1167_p6, 1, 0 }
  0x1c   : > { %p1180_p9 = por %p1167_p6, %p78_p5  ;;  %p130_p10 = scmp.eq.s32.totalorder %s648_s9, 3 }
  0x1d   : > { %p135_p11 = scmp.ne.s32.totalorder %s1015_s26, %s1011_s25  ;;  %p136_p12 = scmp.eq.s32.totalorder %s649_s10, 3 }
  0x1e   : > { %s1534_s15 = scalar_select %p1180_p9, 1, 0 }
  0x1f   : > { %p1186_p13 = por %p130_p10, %p129_p8  ;;  %p650_p0 = scmp.ge.s32.totalorder %s1051_s8, 1 }
  0x20   : > { %p1191_p1 = por %p136_p12, %p135_p11  ;;  %p143_p2 = scmp.lt.s32.totalorder %s1051_s8, 5 }
  0x21   : > { %s1535_s16 = scalar_select %p1186_p13, 1, 0 }
  0x22   : > { %s1536_s17 = scalar_select %p1191_p1, 1, 0 }
  0x23   : > { %p1196_p3 = pnand %p650_p0, %p143_p2  ;;  %s1058_s19 = smov [#allocation5]  }
  0x24   : > { %1537 = sst [smem:[#allocation17_spill]] %s1536_s17  ;;  %s155_s20 = sshll.u32 %s1058_s19, 4  ;;  %s156_s20 = int_to_ptr.vmem [resolvable:$true] %s155_s20 }
  0x25   : > { %s1538_s18 = scalar_select %p1196_p3, 1, 0 }
  0x26   : > { %p728_p4 = pneg %p1196_p3  ;;  %p741_p5 = scmp.lt.s32.totalorder %s1051_s8, 4 }
  0x27   : > { %s1541_s1 = sld [smem:[#allocation19_spill]] }
  0x28   : > { %p1205_p8 = pnand %p728_p4, %p1167_p6  ;;  %p1211_p10 = pnand %p741_p5, %p1172_p7 }
  0x2a   : > { %s1540_s22 = scalar_select %p1211_p10, 1, 0 }
  0x2b   : > { %p863_p12 = pneg %p1205_p8 }
  0x2d   : > { %s861_s28 = scalar_lea.hbm %s1541_s1, 8192 }
  0x2e   : > { %p862_p11 = scmp.ne.s32.totalorder %s1541_s1, %s861_s28  ;;  %p868_p4 = scmp.lt.u32.totalorder %s861_s28, %s1541_s1 }
  0x30   : > { %p864_p0 = pnand %p863_p12, %p862_p11 }
  0x32   : > { %p865_p2 = pneg %p864_p0 }
  0x34   : > { %p870_p7 = pnand %p868_p4, %p865_p2 }
  0x36   : > { %873 = shalt.err (!%p870_p7)
}
  0x37   : > { %s874_s14 = scalar_lea.vmem %s156_s20, 8192  ;;  %p882_p9 = scmp.lt.s32.totalorder %s156_s20, %s156_s20 }
  0x38   : > { %p875_p5 = scmp.ne.s32.totalorder %s156_s20, %s874_s14  ;;  %p883_p6 = scmp.lt.s32.totalorder %s874_s14, %s874_s14 }
  0x3a   : > { %p877_p1 = pnand %p875_p5, %p863_p12  ;;  %p884_p3 = por %p883_p6, %p882_p9 }
  0x3c   : > { %p878_p13 = pneg %p877_p1 }
  0x3e   : > { %p885_p10 = pnand %p884_p3, %p878_p13 }
  0x40   : > { %888 = shalt.err (!%p885_p10)
}
  0x41   : > { %s1059_s23 = smov 128   ;;  %s1060_s13 = smov 8  }
  0x42   : > { %731 = dma.hbm_to_vmem [thread:$0]  (!%p1205_p8), %s1541_s1, 8192, %s156_s20, [#allocation6], %s1059_s23, %s1059_s23, %s1060_s13  }
  0x43   : > { %s34_s9 = sadd.s32 1, %s1043_s6  ;;  %s37_s10 = sadd.s32 1, %s1047_s7 }
  0x44   : > { %p35_p6 = scmp.ge.s32.totalorder %s34_s9, 2  ;;  %s169_s19 = sand.u32 1, %s1031_s30  }
  0x45   : > { %s653_s14 = sshll.u32 %s169_s19, 8  ;;  %s670_s21 = sshll.u32 %s1043_s6, 8 }
  0x46   : > { %s1564_s9 = smov (%p35_p6, %s34_s9), 0  ;;  %s1566_s10 = smov (!%p35_p6, %s37_s10), %s1047_s7 }
  0x47   : > { %1542 = sst [smem:[#allocation18_spill]] %s1564_s9  ;;  %s62_s11 = ssub.s32 %s1043_s6, %s1564_s9 }
  0x48   : > { %p39_p9 = scmp.ge.s32.totalorder %s1566_s10, 2  ;;  %p63_p13 = scmp.eq.s32.totalorder %s62_s11, 0 }
  0x49   : > { %s173_s24 = scalar_lea.vmem [#allocation8], %s653_s14  ;;  %s1543_s23 = sadd.s32 1, %s1031_s30 }
  0x4a   : > { %s180_s20 = sshll.u32 %s173_s24, 4  ;;  %s1568_s10 = smov (%p39_p9, %s1566_s10), 0  ;;  %s1254_s20 = int_to_ptr.vmem [resolvable:$true] %s180_s20 }
  0x4b   : > { %s1245_s13 = scalar_select %p63_p13, %s1031_s30, %s1543_s23  }
  0x4c   : > { %s114_s28 = ssub.s32 %s1047_s7, %s1568_s10  ;;  %s1252_s25 = scalar_lea.hbm %s1516_s2, %s670_s21 }
  0x4d   : > { %s116_s9 = sor.u32 %s114_s28, %s62_s11  ;;  %s1544_s14 = sadd.s32 1, %s1019_s27 }
  0x4e   : > { %p117_p1 = scmp.eq.s32.totalorder %s116_s9, 0  ;;  %s1261_s6 = scalar_lea.sflag [#allocation9], %s169_s19 }
  0x4f   : > { %s889_s23 = scalar_lea.hbm %s1252_s25, 4096  ;;  %p1545_p8 = scmp.ne.s32.totalorder %s1540_s22, 0 }
  0x50   : > { %s1259_s24 = scalar_select %p117_p1, %s1019_s27, %s1544_s14  }
  0x51   : > { %p890_p3 = scmp.ne.s32.totalorder %s1252_s25, %s889_s23  ;;  %p891_p10 = pneg %p1545_p8 }
  0x52   : > { %s894_s11 = scalar_lea.hbm %s1516_s2, 8192  ;;  %p895_p0 = scmp.lt.u32.totalorder %s1252_s25, %s1516_s2 }
  0x53   : > { %p892_p11 = pnand %p891_p10, %p890_p3  ;;  %p896_p2 = scmp.lt.u32.totalorder %s894_s11, %s889_s23 }
  0x54   : > { %p898_p7 = scmp.lt.u32.totalorder %s889_s23, %s1252_s25 }
  0x55   : > { %p893_p12 = pneg %p892_p11  ;;  %p897_p4 = por %p896_p2, %p895_p0 }
  0x57   : > { %p899_p5 = por %p898_p7, %p897_p4 }
  0x59   : > { %p900_p6 = pnand %p899_p5, %p893_p12 }
  0x5b   : > { %903 = shalt.err (!%p900_p6)
}
  0x5c   : > { %s904_s9 = scalar_lea.vmem %s1254_s20, 4096  ;;  %s1061_s19 = smov [#allocation8]  }
  0x5d   : > { %p905_p9 = scmp.ne.s32.totalorder %s1254_s20, %s904_s9  ;;  %s909_s14 = sshll.u32 %s1061_s19, 4  ;;  %s910_s14 = int_to_ptr.vmem [resolvable:$false] %s909_s14 }
  0x5e   : > { %s911_s1 = scalar_lea.vmem %s910_s14, 8192  ;;  %p912_p3 = scmp.lt.s32.totalorder %s1254_s20, %s910_s14 }
  0x5f   : > { %p907_p13 = pnand %p905_p9, %p891_p10  ;;  %p913_p11 = scmp.lt.s32.totalorder %s911_s1, %s904_s9 }
  0x61   : > { %p908_p1 = pneg %p907_p13  ;;  %p914_p0 = por %p913_p11, %p912_p3 }
  0x63   : > { %p915_p2 = pnand %p914_p0, %p908_p1 }
  0x65   : > { %918 = shalt.err (!%p915_p2)
}
  0x66   : > { %s1062_s23 = smov 512   ;;  %s1063_s17 = smov 256  }
  0x67   : > { %s1064_s11 = smov 16   ;;  %p1546_p10 = scmp.ne.s32.totalorder %s1538_s18, 0 }
  0x68   : > { %735 = dma.hbm_to_vmem [thread:$0]  (!%p1545_p8), %s1252_s25, 4096, %s1254_s20, %s1261_s6, %s1062_s23, %s1063_s17, %s1064_s11  }
  0x69   : > { %200 = sbr.rel (%p1546_p10) target bundleno = 435 (0x1b3), region = 32  ;;  %p1547_p12 = scmp.ne.s32.totalorder (!%p1546_p10), %s1532_s12, 0 }
  0x70   : > { %998 = dma.done.wait (%p1547_p12), [#allocation6], 8192  }
  0x71   : > { %1000 = vsyncadd (%p1547_p12), [#allocation6], 4294959104  ;;  %s206_s21 = sand.u32 1, %s1027_s29   ;;  %p1548_p4 = scmp.ne.s32.totalorder %s1534_s15, 0 }
  0x72   : > { %s658_s28 = sshll.u32 %s206_s21, 8  ;;  %s207_s9 = scalar_lea.sflag [#allocation9], %s206_s21 }
  0x73   : > { %s1296_s19 = scalar_lea.vmem [#allocation8], %s658_s28 }
  0x74   : > { %1002 = dma.done.wait (%p1548_p4), %s207_s9, 4096  }
  0x75   : > { %1004 = vsyncadd (%p1548_p4), %s207_s9, 4294963200  ;;  %s234_s25 = sand.u32 1, %s1015_s26   ;;  %s1304_s6 = sshll.u32 %s1035_s0, 1 }
  0x76   : > { %s659_s12 = sshll.u32 %s234_s25, 8  ;;  %p239_p8 = scmp.lt.s32.totalorder %s1304_s6, 3 }
  0x77   : > { %s1316_s15 = scalar_lea.vmem [#allocation10], %s659_s12  ;;  %p661_p7 = scmp.ne.s32.totalorder %s1035_s0, 0 }
  0x78   : > { %s1310_s18 = scalar_select %p239_p8, %s1304_s6, 3 }
  0x79   : > { %248 = sbr.rel (%p661_p7) target bundleno = 141 (0x8d), region = 44  ;;  %s1053_s1 = smov (!%p661_p7), 0  }
  0x7a   : > { %s241_s14 = scalar_lea.vmem %s1517_s3, %s1310_s18 }
  0x80 LB: >> { %s662_s23 = sshll.u32 %s1039_s5, 7  ;;  %s261_s28 = scalar_lea.vmem [#allocation2], %s1055_s1  ;;  %s1055_s1 = sphi %s1053_s1, %s254_s1  }
  0x81   : >> { %s256_s17 = sadd.s32 %s1055_s1, %s662_s23  ;;  %s254_s1 = sadd.s32 1, %s1055_s1  }
  0x82   : >> { %s257_s11 = sld [smem:[#allocation4 + %s256_s17]]  ;;  %p251_p5 = scmp.ge.s32.totalorder %s254_s1, 128  }
  0x86   : > { %253 = sbr.rel (!%p251_p5) target bundleno = 128 (0x80), region = 98 }
  0x88   : >> { %s258_s21 = scalar_lea.vmem [#allocation5], %s257_s11 }
  0x89   : >> { %v259_v0 = vld [vmem:[%s258_s21] sm:$0x1] }
  0x8a   : >> { %v260_v1 = vmax.f32 %v259_v0, 0.0 }
  0x8c   : >> { %262 = vst [vmem:[%s261_s28] sm:$0x1] %v260_v1 }
  0x8d PF: > { %v280_v2 = vld [vmem:[%s1296_s19 + $0x8] sm:$0xff]  ;;  %v282_v3 = vld [vmem:[%s1296_s19 + $0x18] sm:$0xff]  ;;  %v279_v4 = vld [vmem:[%s1296_s19] sm:$0xff]  ;;  %v1065_v9 = vmov 0.0   ;;  %p1549_p9 = scmp.ne.s32.totalorder %s1535_s16, 0  ;;  %s1066_s23 = smov [#allocation10]  }
  0x8e   : > { %v672_v5 = vpack.c.bf16 %v282_v3, %v280_v2  ;;  %v281_v6 = vld [vmem:[%s1296_s19 + $0x10] sm:$0xff]  ;;  %v284_v7 = vld [vmem:[%s1296_s19 + $0x28] sm:$0xff]  ;;  %v286_v8 = vld [vmem:[%s1296_s19 + $0x38] sm:$0xff]  ;;  %387 = vmatprep.mubr.f32.mxu0 %v1065_v9  ;;  %435 = vmatprep.mubr.f32.mxu1 %v1065_v9  ;;  %v313_v3 = vlaneseq  ;;  %s923_s17 = sshll.u32 %s1066_s23, 4  ;;  %s924_s17 = int_to_ptr.vmem [resolvable:$false] %s923_s17 }
  0x8f   : > { %v674_v10 = vpack.c.bf16 %v281_v6, %v279_v4  ;;  %v676_v11 = vpack.c.bf16 %v286_v8, %v284_v7  ;;  %v283_v12 = vld [vmem:[%s1296_s19 + $0x20] sm:$0xff]  ;;  %v285_v13 = vld [vmem:[%s1296_s19 + $0x30] sm:$0xff]  ;;  %v288_v14 = vld [vmem:[%s1296_s19 + $0x48] sm:$0xff]  ;;  %s925_s11 = scalar_lea.vmem %s924_s17, 8192 }
  0x90   : > { %673 = vmatprep.subr.bf16.mxu0 %v672_v5  ;;  %704 = vmatprep.subr.bf16.mxu1 %v672_v5  ;;  %v290_v15 = vld [vmem:[%s1296_s19 + $0x58] sm:$0xff]  ;;  %v678_v16 = vpack.c.bf16 %v285_v13, %v283_v12  ;;  %v287_v18 = vld [vmem:[%s1296_s19 + $0x40] sm:$0xff]  ;;  %v289_v19 = vld [vmem:[%s1296_s19 + $0x50] sm:$0xff]  ;;  %v314_v4 = vshrl.u32 %v313_v3, 7 }
  0x91   : > { %675 = vmatpush1.bf16.msra.mxu0 %v674_v10  ;;  %712 = vmatpush1.bf16.msra.mxu1 %v674_v10  ;;  %v680_v17 = vpack.c.bf16 %v290_v15, %v288_v14  ;;  %v292_v20 = vld [vmem:[%s1296_s19 + $0x68] sm:$0xff]  ;;  %v294_v21 = vld [vmem:[%s1296_s19 + $0x78] sm:$0xff]  ;;  %v682_v22 = vpack.c.bf16 %v289_v19, %v287_v18  ;;  %v291_v24 = vld [vmem:[%s1296_s19 + $0x60] sm:$0xff] }
  0x92   : > { %677 = vmatprep.subr.bf16.mxu0 %v676_v11  ;;  %705 = vmatprep.subr.bf16.mxu1 %v676_v11  ;;  %v684_v23 = vpack.c.bf16 %v294_v21, %v292_v20  ;;  %v293_v25 = vld [vmem:[%s1296_s19 + $0x70] sm:$0xff]  ;;  %v296_v26 = vld [vmem:[%s1296_s19 + $0x88] sm:$0xff]  ;;  %v298_v27 = vld [vmem:[%s1296_s19 + $0x98] sm:$0xff]  ;;  %v315_v5 = vsub.s32 0, %v314_v4  ;;  %v319_v7 = vsub.s32 1, %v314_v4 }
  0x93   : > { %v686_v28 = vpack.c.bf16 %v293_v25, %v291_v24  ;;  %v688_v29 = vpack.c.bf16 %v298_v27, %v296_v26  ;;  %v295_v30 = vld [vmem:[%s1296_s19 + $0x80] sm:$0xff]  ;;  %v297_v31 = vld [vmem:[%s1296_s19 + $0x90] sm:$0xff]  ;;  %v300_v32 = vld [vmem:[%s1296_s19 + $0xa8] sm:$0xff] }
  0x94   : > { %v302_v33 = vld [vmem:[%s1296_s19 + $0xb8] sm:$0xff]  ;;  %v690_v34 = vpack.c.bf16 %v297_v31, %v295_v30  ;;  %v299_v36 = vld [vmem:[%s1296_s19 + $0xa0] sm:$0xff]  ;;  %v301_v37 = vld [vmem:[%s1296_s19 + $0xb0] sm:$0xff] }
  0x95   : > { %679 = vmatpush1.bf16.msra.mxu0 %v678_v16  ;;  %713 = vmatpush1.bf16.msra.mxu1 %v678_v16  ;;  %v692_v35 = vpack.c.bf16 %v302_v33, %v300_v32  ;;  %v304_v38 = vld [vmem:[%s1296_s19 + $0xc8] sm:$0xff]  ;;  %v306_v39 = vld [vmem:[%s1296_s19 + $0xd8] sm:$0xff]  ;;  %v694_v40 = vpack.c.bf16 %v301_v37, %v299_v36  ;;  %v303_v42 = vld [vmem:[%s1296_s19 + $0xc0] sm:$0xff] }
  0x96   : > { %681 = vmatprep.subr.bf16.mxu0 %v680_v17  ;;  %706 = vmatprep.subr.bf16.mxu1 %v680_v17  ;;  %v696_v41 = vpack.c.bf16 %v306_v39, %v304_v38  ;;  %v305_v43 = vld [vmem:[%s1296_s19 + $0xd0] sm:$0xff]  ;;  %v308_v44 = vld [vmem:[%s1296_s19 + $0xe8] sm:$0xff]  ;;  %v310_v45 = vld [vmem:[%s1296_s19 + $0xf8] sm:$0xff] }
  0x97   : > { %v698_v46 = vpack.c.bf16 %v305_v43, %v303_v42  ;;  %v700_v47 = vpack.c.bf16 %v310_v45, %v308_v44  ;;  %v307_v48 = vld [vmem:[%s1296_s19 + $0xe0] sm:$0xff]  ;;  %v309_v49 = vld [vmem:[%s1296_s19 + $0xf0] sm:$0xff]  ;;  %v264_v53 = vld [vmem:[#allocation2 + $0x8] sm:$0xff]  ;;  %s671_s19 = sshll.u32 %s1039_s5, 6 }
  0x98   : > { %v702_v50 = vpack.c.bf16 %v309_v49, %v307_v48  ;;  %v263_v51 = vld [vmem:[#allocation2] sm:$0xff]  ;;  %v272_v54 = vld [vmem:[#allocation2 + $0x48] sm:$0xff]  ;;  %v265_v55 = vld [vmem:[#allocation2 + $0x10] sm:$0xff]  ;;  %s530_s12 = sadd.s32 %s671_s19, %s1304_s6  ;;  %s533_s6 = sshll.u32 %s1316_s15, 4  ;;  %s1443_s6 = int_to_ptr.vmem [resolvable:$true] %s533_s6 }
  0x99   : > { %683 = vmatpush1.bf16.msra.mxu0 %v682_v22  ;;  %714 = vmatpush1.bf16.msra.mxu1 %v682_v22  ;;  %v271_v52 = vld [vmem:[#allocation2 + $0x40] sm:$0xff]  ;;  %v273_v56 = vld [vmem:[#allocation2 + $0x50] sm:$0xff]  ;;  %v266_v57 = vld [vmem:[#allocation2 + $0x18] sm:$0xff]  ;;  %s667_s5 = sshll.u32 %s530_s12, 7  ;;  %s919_s1 = scalar_lea.vmem %s1443_s6, 4096 }
  0x9a   : > { %685 = vmatprep.subr.bf16.mxu0 %v684_v23  ;;  %707 = vmatprep.subr.bf16.mxu1 %v684_v23  ;;  %v274_v58 = vld [vmem:[#allocation2 + $0x58] sm:$0xff]  ;;  %v267_v59 = vld [vmem:[#allocation2 + $0x20] sm:$0xff]  ;;  %v268_v61 = vld [vmem:[#allocation2 + $0x28] sm:$0xff]  ;;  %s1439_s20 = scalar_lea.hbm %s1518_s4, %s667_s5  ;;  %p920_p6 = scmp.ne.s32.totalorder %s1443_s6, %s919_s1 }
  0x9b   : > { %v275_v60 = vld [vmem:[#allocation2 + $0x60] sm:$0xff]  ;;  %v276_v62 = vld [vmem:[#allocation2 + $0x68] sm:$0xff]  ;;  %v269_v63 = vld [vmem:[#allocation2 + $0x30] sm:$0xff]  ;;  %p926_p3 = scmp.lt.s32.totalorder %s1443_s6, %s924_s17  ;;  %p927_p11 = scmp.lt.s32.totalorder %s925_s11, %s919_s1 }
  0x9c   : > { %v277_v0 = vld [vmem:[#allocation2 + $0x70] sm:$0xff]  ;;  %v270_v1 = vld [vmem:[#allocation2 + $0x38] sm:$0xff]  ;;  %p921_p13 = pnand %p920_p6, %p1549_p9 }
  0x9d   : > { %687 = vmatpush1.bf16.msra.mxu0 %v686_v28  ;;  %715 = vmatpush1.bf16.msra.mxu1 %v686_v28  ;;  %v278_v2 = vld [vmem:[#allocation2 + $0x78] sm:$0xff]  ;;  %p928_p0 = por %p927_p11, %p926_p3 }
  0x9e   : > { %689 = vmatprep.subr.bf16.mxu0 %v688_v29  ;;  %708 = vmatprep.subr.bf16.mxu1 %v688_v29  ;;  %v311_v6 = vld [vmem:[%s241_s14] sm:$0x3]  ;;  %s1453_s14 = scalar_lea.sflag [#allocation7], %s234_s25  ;;  %p922_p1 = pneg %p921_p13 }
  0x9f   : > { %v1373_v8 = vrot.slane %v311_v6, %v315_v5 }
  0xa0   : > { %p929_p2 = pnand %p928_p0, %p922_p1 }
  0xa1   : > { %691 = vmatpush1.bf16.msra.mxu0 %v690_v34  ;;  %716 = vmatpush1.bf16.msra.mxu1 %v690_v34 }
  0xa2   : > { %693 = vmatprep.subr.bf16.mxu0 %v692_v35  ;;  %709 = vmatprep.subr.bf16.mxu1 %v692_v35 }
  0xa5   : > { %695 = vmatpush1.bf16.msra.mxu0 %v694_v40  ;;  %717 = vmatpush1.bf16.msra.mxu1 %v694_v40 }
  0xa6   : > { %697 = vmatprep.subr.bf16.mxu0 %v696_v41  ;;  %710 = vmatprep.subr.bf16.mxu1 %v696_v41 }
  0xa9   : > { %699 = vmatpush1.bf16.msra.mxu0 %v698_v46  ;;  %718 = vmatpush1.bf16.msra.mxu1 %v698_v46 }
  0xaa   : > { %701 = vmatprep.subr.bf16.mxu0 %v700_v47  ;;  %711 = vmatprep.subr.bf16.mxu1 %v700_v47 }
  0xad   : > { %703 = vmatpush1.bf16.msra.mxu0 %v702_v50  ;;  %719 = vmatpush1.bf16.msra.mxu1 %v702_v50 }
  0xb0   : > { %388 = vmatmul.mubr.f32.vlgmr.msra.gmra.mrb[0].mxu0 %v263_v51  ;;  %436 = vmatmul.mubr.f32.vlgmr.msra.gmra.mrb[0].mxu1 %v271_v52 }
  0xb1   : > { %393 = vmatprep.mubr.f32.mxu0 %v1065_v9  ;;  %441 = vmatprep.mubr.f32.mxu1 %v1065_v9 }
  0xb4   : > { %394 = vmatmul.mubr.f32.gmra.mrb[2].mxu0 %v264_v53  ;;  %442 = vmatmul.mubr.f32.gmra.mrb[2].mxu1 %v272_v54 }
  0xb5   : > { %399 = vmatprep.mubr.f32.mxu0 %v1065_v9  ;;  %447 = vmatprep.mubr.f32.mxu1 %v1065_v9 }
  0xb8   : > { %400 = vmatmul.mubr.f32.gmra.mrb[4].mxu0 %v265_v55  ;;  %448 = vmatmul.mubr.f32.gmra.mrb[4].mxu1 %v273_v56 }
  0xb9   : > { %405 = vmatprep.mubr.f32.mxu0 %v1065_v9  ;;  %453 = vmatprep.mubr.f32.mxu1 %v1065_v9 }
  0xbc   : > { %406 = vmatmul.mubr.f32.gmra.mrb[6].mxu0 %v266_v57  ;;  %454 = vmatmul.mubr.f32.gmra.mrb[6].mxu1 %v274_v58 }
  0xbd   : > { %411 = vmatprep.mubr.f32.mxu0 %v1065_v9  ;;  %459 = vmatprep.mubr.f32.mxu1 %v1065_v9 }
  0xc0   : > { %412 = vmatmul.mubr.f32.gmra.mrb[8].mxu0 %v267_v59  ;;  %460 = vmatmul.mubr.f32.gmra.mrb[8].mxu1 %v275_v60 }
  0xc1   : > { %417 = vmatprep.mubr.f32.mxu0 %v1065_v9  ;;  %465 = vmatprep.mubr.f32.mxu1 %v1065_v9 }
  0xc4   : > { %418 = vmatmul.mubr.f32.gmra.mrb[10].mxu0 %v268_v61  ;;  %466 = vmatmul.mubr.f32.gmra.mrb[10].mxu1 %v276_v62 }
  0xc5   : > { %423 = vmatprep.mubr.f32.mxu0 %v1065_v9  ;;  %471 = vmatprep.mubr.f32.mxu1 %v1065_v9 }
  0xc8   : > { %424 = vmatmul.mubr.f32.gmra.mrb[12].mxu0 %v269_v63  ;;  %472 = vmatmul.mubr.f32.gmra.mrb[12].mxu1 %v277_v0 }
  0xc9   : > { %429 = vmatprep.mubr.f32.mxu0 %v1065_v9  ;;  %477 = vmatprep.mubr.f32.mxu1 %v1065_v9  ;;  %v1375_v9 = vrot.slane %v311_v6, %v319_v7 }
  0xcc   : > { %430 = vmatmul.mubr.f32.gmra.mrb[14].mxu0 %v270_v1  ;;  %478 = vmatmul.mubr.f32.gmra.mrb[14].mxu1 %v278_v2 }
 0x183   : > { %v389_v10 = vpop.f32.mrb[0].mxu0  ;;  %v437_v11 = vpop.f32.mrb[0].mxu1 }
 0x184   : > { %v390_v12 = vadd.f32 %v389_v10, %v1373_v8  ;;  %v438_v13 = vadd.f32 %v437_v11, %v1373_v8  ;;  %v391_v14 = vpop.f32.mrb[1].mxu0  ;;  %v439_v15 = vpop.f32.mrb[1].mxu1 }
 0x185   : > { %v392_v16 = vadd.f32 %v391_v14, %v1375_v9  ;;  %v440_v17 = vadd.f32 %v439_v15, %v1375_v9 }
 0x186   : > { %484 = vst [vmem:[%s1316_s15] sm:$0xff] %v390_v12  ;;  %500 = vst [vmem:[%s1316_s15 + $0x80] sm:$0xff] %v438_v13 }
 0x187   : > { %485 = vst [vmem:[%s1316_s15 + $0x8] sm:$0xff] %v392_v16  ;;  %501 = vst [vmem:[%s1316_s15 + $0x88] sm:$0xff] %v440_v17  ;;  %v395_v18 = vpop.f32.mrb[2].mxu0  ;;  %v443_v19 = vpop.f32.mrb[2].mxu1 }
 0x188   : > { %v396_v20 = vadd.f32 %v395_v18, %v1373_v8  ;;  %v444_v21 = vadd.f32 %v443_v19, %v1373_v8  ;;  %v397_v22 = vpop.f32.mrb[3].mxu0  ;;  %v445_v23 = vpop.f32.mrb[3].mxu1 }
 0x189   : > { %v398_v24 = vadd.f32 %v397_v22, %v1375_v9  ;;  %v446_v25 = vadd.f32 %v445_v23, %v1375_v9 }
 0x18a   : > { %486 = vst [vmem:[%s1316_s15 + $0x10] sm:$0xff] %v396_v20  ;;  %502 = vst [vmem:[%s1316_s15 + $0x90] sm:$0xff] %v444_v21 }
 0x18b   : > { %487 = vst [vmem:[%s1316_s15 + $0x18] sm:$0xff] %v398_v24  ;;  %503 = vst [vmem:[%s1316_s15 + $0x98] sm:$0xff] %v446_v25  ;;  %v401_v26 = vpop.f32.mrb[4].mxu0  ;;  %v449_v27 = vpop.f32.mrb[4].mxu1 }
 0x18c   : > { %v402_v28 = vadd.f32 %v401_v26, %v1373_v8  ;;  %v450_v29 = vadd.f32 %v449_v27, %v1373_v8  ;;  %v403_v30 = vpop.f32.mrb[5].mxu0  ;;  %v451_v31 = vpop.f32.mrb[5].mxu1 }
 0x18d   : > { %v404_v32 = vadd.f32 %v403_v30, %v1375_v9  ;;  %v452_v33 = vadd.f32 %v451_v31, %v1375_v9 }
 0x18e   : > { %488 = vst [vmem:[%s1316_s15 + $0x20] sm:$0xff] %v402_v28  ;;  %504 = vst [vmem:[%s1316_s15 + $0xa0] sm:$0xff] %v450_v29 }
 0x18f   : > { %489 = vst [vmem:[%s1316_s15 + $0x28] sm:$0xff] %v404_v32  ;;  %505 = vst [vmem:[%s1316_s15 + $0xa8] sm:$0xff] %v452_v33  ;;  %v407_v34 = vpop.f32.mrb[6].mxu0  ;;  %v455_v35 = vpop.f32.mrb[6].mxu1 }
 0x190   : > { %v408_v36 = vadd.f32 %v407_v34, %v1373_v8  ;;  %v456_v37 = vadd.f32 %v455_v35, %v1373_v8  ;;  %v409_v38 = vpop.f32.mrb[7].mxu0  ;;  %v457_v39 = vpop.f32.mrb[7].mxu1 }
 0x191   : > { %v410_v40 = vadd.f32 %v409_v38, %v1375_v9  ;;  %v458_v41 = vadd.f32 %v457_v39, %v1375_v9 }
 0x192   : > { %490 = vst [vmem:[%s1316_s15 + $0x30] sm:$0xff] %v408_v36  ;;  %506 = vst [vmem:[%s1316_s15 + $0xb0] sm:$0xff] %v456_v37 }
 0x193   : > { %491 = vst [vmem:[%s1316_s15 + $0x38] sm:$0xff] %v410_v40  ;;  %507 = vst [vmem:[%s1316_s15 + $0xb8] sm:$0xff] %v458_v41  ;;  %v413_v42 = vpop.f32.mrb[8].mxu0  ;;  %v461_v43 = vpop.f32.mrb[8].mxu1 }
 0x194   : > { %v414_v44 = vadd.f32 %v413_v42, %v1373_v8  ;;  %v462_v45 = vadd.f32 %v461_v43, %v1373_v8  ;;  %v415_v46 = vpop.f32.mrb[9].mxu0  ;;  %v463_v47 = vpop.f32.mrb[9].mxu1 }
 0x195   : > { %v416_v48 = vadd.f32 %v415_v46, %v1375_v9  ;;  %v464_v49 = vadd.f32 %v463_v47, %v1375_v9 }
 0x196   : > { %492 = vst [vmem:[%s1316_s15 + $0x40] sm:$0xff] %v414_v44  ;;  %508 = vst [vmem:[%s1316_s15 + $0xc0] sm:$0xff] %v462_v45 }
 0x197   : > { %493 = vst [vmem:[%s1316_s15 + $0x48] sm:$0xff] %v416_v48  ;;  %509 = vst [vmem:[%s1316_s15 + $0xc8] sm:$0xff] %v464_v49  ;;  %v419_v50 = vpop.f32.mrb[10].mxu0  ;;  %v467_v51 = vpop.f32.mrb[10].mxu1 }
 0x198   : > { %v420_v52 = vadd.f32 %v419_v50, %v1373_v8  ;;  %v468_v53 = vadd.f32 %v467_v51, %v1373_v8  ;;  %v421_v54 = vpop.f32.mrb[11].mxu0  ;;  %v469_v55 = vpop.f32.mrb[11].mxu1 }
 0x199   : > { %v422_v56 = vadd.f32 %v421_v54, %v1375_v9  ;;  %v470_v57 = vadd.f32 %v469_v55, %v1375_v9 }
 0x19a   : > { %494 = vst [vmem:[%s1316_s15 + $0x50] sm:$0xff] %v420_v52  ;;  %510 = vst [vmem:[%s1316_s15 + $0xd0] sm:$0xff] %v468_v53 }
 0x19b   : > { %495 = vst [vmem:[%s1316_s15 + $0x58] sm:$0xff] %v422_v56  ;;  %511 = vst [vmem:[%s1316_s15 + $0xd8] sm:$0xff] %v470_v57  ;;  %v425_v58 = vpop.f32.mrb[12].mxu0  ;;  %v473_v59 = vpop.f32.mrb[12].mxu1 }
 0x19c   : > { %v426_v60 = vadd.f32 %v425_v58, %v1373_v8  ;;  %v474_v61 = vadd.f32 %v473_v59, %v1373_v8  ;;  %v427_v62 = vpop.f32.mrb[13].mxu0  ;;  %v475_v63 = vpop.f32.mrb[13].mxu1 }
 0x19d   : > { %v428_v0 = vadd.f32 %v427_v62, %v1375_v9  ;;  %v476_v1 = vadd.f32 %v475_v63, %v1375_v9 }
 0x19e   : > { %496 = vst [vmem:[%s1316_s15 + $0x60] sm:$0xff] %v426_v60  ;;  %512 = vst [vmem:[%s1316_s15 + $0xe0] sm:$0xff] %v474_v61 }
 0x19f   : > { %497 = vst [vmem:[%s1316_s15 + $0x68] sm:$0xff] %v428_v0  ;;  %513 = vst [vmem:[%s1316_s15 + $0xe8] sm:$0xff] %v476_v1  ;;  %v431_v2 = vpop.f32.mrb[14].mxu0  ;;  %v479_v3 = vpop.f32.mrb[14].mxu1 }
 0x1a0   : > { %v432_v4 = vadd.f32 %v431_v2, %v1373_v8  ;;  %v480_v5 = vadd.f32 %v479_v3, %v1373_v8  ;;  %v433_v6 = vpop.f32.mrb[15].mxu0  ;;  %v481_v7 = vpop.f32.mrb[15].mxu1 }
 0x1a1   : > { %v434_v10 = vadd.f32 %v433_v6, %v1375_v9  ;;  %v482_v11 = vadd.f32 %v481_v7, %v1375_v9 }
 0x1a2   : > { %498 = vst [vmem:[%s1316_s15 + $0x70] sm:$0xff] %v432_v4  ;;  %514 = vst [vmem:[%s1316_s15 + $0xf0] sm:$0xff] %v480_v5 }
 0x1a3   : > { %499 = vst [vmem:[%s1316_s15 + $0x78] sm:$0xff] %v434_v10  ;;  %515 = vst [vmem:[%s1316_s15 + $0xf8] sm:$0xff] %v482_v11 }
 0x1a4   : > { %932 = shalt.err (!%p929_p2)
}
 0x1a5   : > { %s933_s25 = scalar_lea.hbm %s1439_s20, 4096  ;;  %s937_s28 = scalar_lea.hbm %s1518_s4, 16384 }
 0x1a6   : > { %p934_p10 = scmp.ne.s32.totalorder %s1439_s20, %s933_s25  ;;  %p938_p8 = scmp.lt.u32.totalorder %s1439_s20, %s1518_s4 }
 0x1a7   : > { %p939_p7 = scmp.lt.u32.totalorder %s937_s28, %s933_s25  ;;  %p941_p6 = scmp.lt.u32.totalorder %s933_s25, %s1439_s20 }
 0x1a8   : > { %p935_p12 = pnand %p934_p10, %p1549_p9 }
 0x1a9   : > { %p940_p5 = por %p939_p7, %p938_p8 }
 0x1aa   : > { %p936_p4 = pneg %p935_p12 }
 0x1ab   : > { %p942_p13 = por %p941_p6, %p940_p5 }
 0x1ad   : > { %p943_p1 = pnand %p942_p13, %p936_p4 }
 0x1af   : > { %946 = shalt.err (!%p943_p1)
}
 0x1b0   : > { %s1067_s19 = smov 256   ;;  %s1068_s12 = smov 512  }
 0x1b1   : > { %s1069_s5 = smov 16  }
 0x1b2   : > { %726 = dma.vmem_to_hbm [thread:$0]  (%p1549_p9), %s1443_s6, 4096, %s1439_s20, %s1453_s14, %s1067_s19, %s1068_s12, %s1069_s5  }
 0x1b3 PF: > { %s1550_s18 = sld [smem:[#allocation15_spill]]  ;;  %s1551_s22 = sld [smem:[#allocation17_spill]] }
 0x1b4   : > { %p743_p3 = scmp.ge.s32.totalorder %s1051_s8, 2 }
 0x1b9   : > { %s548_s1 = sand.u32 1, %s1550_s18   ;;  %p1552_p11 = scmp.ne.s32.totalorder %s1551_s22, 0 }
 0x1ba   : > { %s549_s23 = scalar_lea.sflag [#allocation7], %s548_s1 }
 0x1bb   : > { %p737_p0 = pnand %p743_p3, %p1552_p11 }
 0x1bd   : > { %1006 = dma.done.wait (!%p737_p0), %s549_s23, 4096  }
 0x1be   : > { %1008 = vsyncadd (!%p737_p0), %s549_s23, 4294963200  ;;  %s25_s8 = sadd.s32 1, %s1051_s8   ;;  %s1553_s0 = sld [smem:[#allocation16_spill]] }
 0x1bf   : > { %p22_p2 = scmp.ge.s32.totalorder %s25_s8, 6   ;;  %s1554_s6 = sld [smem:[#allocation18_spill]] }
 0x1c0   : > { %s1555_s25 = smov %s1015_s26  ;;  %s1556_s26 = smov %s1019_s27 }
 0x1c1   : > { %s1557_s27 = smov %s1259_s24  ;;  %s1558_s28 = smov %s1027_s29 }
 0x1c2   : > { %s1559_s29 = smov %s1031_s30  ;;  %s1560_s30 = smov %s1245_s13 }
 0x1c3   : > { %s1561_s5 = smov %s1047_s7  ;;  %s1562_s7 = smov %s1568_s10 }
 0x1c4   :  { %24 = sbr.rel (!%p22_p2) target bundleno = 22 (0x16), region = 109 }
 0x1cb   :  { %554 = vsyncpa [#allocation6], 1 }
 0x1cc   :  { %556 = vsyncpa [#allocation6 + $0x1], 1 }
 0x1cd   :  { %557 = vsyncpa [#allocation9], 1 }
 0x1ce   :  { %559 = vsyncpa [#allocation9 + $0x1], 1 }
 0x1cf   :  { %560 = vsyncpa [#allocation7], 1 }
 0x1d0   :  { %562 = vsyncpa [#allocation7 + $0x1], 1 }

</bundles_post_ra>
